<compile_context>
chip_gen: v5e
topology: v5e:2x2
jax: 0.10.0
libtpu: 0.0.40
codegen_flags: <defaults>
</compile_context>

<pallas_src>
import numpy as np
import jax
import jax.numpy as jnp
from jax import lax
from jax.experimental import pallas as pl
from jax.experimental.pallas import tpu as pltpu


def _make_dct_matrix(n: int) -> np.ndarray:
    """Orthonormal DCT-II matrix D (float64 numpy), so dct(v) = D @ v (norm='ortho')."""
    k = np.arange(n)[:, None].astype(np.float64)
    m = np.arange(n)[None, :].astype(np.float64)
    d = np.cos(np.pi * (2.0 * m + 1.0) * k / (2.0 * n))
    d[0, :] *= np.sqrt(1.0 / n)
    d[1:, :] *= np.sqrt(2.0 / n)
    return d


def _planes_per_block(n_planes: int, hw: int, itemsize: int) -> int:
    """Planes per grid step: target ~1 MiB input blocks (mem-bound kernel -> amortize the
    fixed per-step overhead), sublane (8) aligned, never larger than the plane count."""
    if n_planes <= 8:
        return n_planes                      # block row dim == full array dim (allowed)
    target_bytes = 1 << 20
    p = max(8, target_bytes // (hw * itemsize))
    p = min(int(p), n_planes)
    p -= p % 8                               # keep the sublane dim 8-aligned
    return int(p)


def dct_loss_pallas(x: jnp.ndarray, t: jnp.ndarray) -> jnp.ndarray:
    assert x.shape == t.shape and x.ndim == 4, "expected NCHW inputs"
    B, C, H, W = x.shape
    if C == 3:
        # TODO(synk): rgb_to_yrgb branch of the PyTorch module is not implemented.
        raise NotImplementedError("DCTLoss rgb_to_yrgb (C==3) branch not implemented")

    n_planes = B * C
    HW = H * W
    itemsize = jnp.dtype(x.dtype).itemsize
    assert HW <= 1024, "TODO(synk): large planes need the separable two-pass DCT form"

    # Plane-major, lane-dense layout.  Reshape only (no data copy beyond what XLA fuses);
    # the ragged last block is masked in-kernel, so no jnp.pad of the full tensor.
    x2 = x.reshape(n_planes, HW)
    t2 = t.reshape(n_planes, HW)

    P = _planes_per_block(n_planes, HW, itemsize)
    steps = -(-n_planes // P)
    needs_mask = (n_planes % P) != 0

    # Compile-time constant: (D_H kron D_W)^T, so dct2(plane).flatten() = plane.flatten() @ KT.
    kt = jnp.asarray(np.kron(_make_dct_matrix(H), _make_dct_matrix(W)).T, dtype=jnp.float32)

    def kernel(x_ref, t_ref, kt_ref, out_ref, acc_ref):
        step = pl.program_id(0)

        @pl.when(step == 0)
        def _init():
            acc_ref[...] = jnp.zeros_like(acc_ref)

        # Diff first (DCT is linear) -> a single DCT chain; cast on-chip.
        d = x_ref[...].astype(jnp.float32) - t_ref[...].astype(jnp.float32)   # (P, HW)
        if needs_mask:
            # Zero rows past the true plane count (last partial block).  jnp.where (select,
            # not multiply) so garbage in the out-of-bounds region cannot propagate NaNs.
            row = step * P + lax.broadcasted_iota(jnp.int32, d.shape, 0)
            d = jnp.where(row < n_planes, d, jnp.float32(0.0))
        # Whole 2-D DCT of every plane as one MXU-dense matmul: (P, HW) @ (HW, HW).
        z = jnp.dot(d, kt_ref[...], preferred_element_type=jnp.float32)
        acc_ref[...] = acc_ref[...] + jnp.abs(z)

        @pl.when(step == pl.num_programs(0) - 1)
        def _epilogue():
            out_ref[...] = jnp.reshape(jnp.sum(acc_ref[...]), (1, 1))

    flops = steps * (2 * P * HW * HW) + 4 * n_planes * HW
    bytes_accessed = 2 * n_planes * HW * itemsize + HW * HW * 4 + 4
    cost = pl.CostEstimate(flops=int(flops), transcendentals=0,
                           bytes_accessed=int(bytes_accessed))

    vmem_need = (2 * 2 * P * HW * itemsize   # x, t blocks, double-buffered
                 + 2 * HW * HW * 4           # Kron constant (default double-buffered)
                 + P * HW * 4                # f32 accumulator scratch
                 + 2 * 8 * 128 * 4)          # output + slack
    vmem_limit = int(min(48 << 20, max(16 << 20, 2 * vmem_need)))   # <=48 MiB (v7x headroom)

    out = pl.pallas_call(
        kernel,
        out_shape=jax.ShapeDtypeStruct((1, 1), jnp.float32),
        grid_spec=pltpu.PrefetchScalarGridSpec(
            num_scalar_prefetch=0,
            grid=(steps,),
            in_specs=[
                pl.BlockSpec((P, HW), lambda i: (i, 0)),
                pl.BlockSpec((P, HW), lambda i: (i, 0)),
                pl.BlockSpec((HW, HW), lambda i: (0, 0)),
            ],
            out_specs=pl.BlockSpec((1, 1), lambda i: (0, 0)),
            scratch_shapes=[pltpu.VMEM((P, HW), jnp.float32)],
        ),
        compiler_params=pltpu.CompilerParams(
            dimension_semantics=("arbitrary",),
            vmem_limit_bytes=vmem_limit,
        ),
        cost_estimate=cost,
    )(x2, t2, kt)

    # F.l1_loss default reduction='mean' over all (unpadded) elements.
    return out[0, 0] / jnp.float32(n_planes * HW)


class DCTLoss:
    """JAX mirror of nunif DCTLoss with default constructor arguments."""

    def __init__(self, window_size=None, overlap=False, loss_function="l1",
                 clamp=False, diag=False):
        assert window_size is None and not overlap and not diag and not clamp
        assert loss_function == "l1"

    def __call__(self, input, target):
        return dct_loss_pallas(input, target)


def _reference(x, t):
    H, W = x.shape[-2], x.shape[-1]
    dh = jnp.asarray(_make_dct_matrix(H), jnp.float32)
    dw = jnp.asarray(_make_dct_matrix(W), jnp.float32)
    dx = jnp.einsum("ij,bcjk,lk->bcil", dh, x.astype(jnp.float32), dw)
    dt = jnp.einsum("ij,bcjk,lk->bcil", dh, t.astype(jnp.float32), dw)
    return jnp.mean(jnp.abs(dx - dt))


if __name__ == "__main__":
    loss_mod = DCTLoss()
    key = jax.random.PRNGKey(0)
    k1, k2, k3, k4 = jax.random.split(key, 4)

    # Case 1: canonical small shape -> single block of 8 planes, lane-dense last dim 256.
    x = jax.random.uniform(k1, (2, 4, 16, 16), dtype=jnp.float32)
    t = jax.random.uniform(k2, (2, 4, 16, 16), dtype=jnp.float32)
    loss = loss_mod(x, t)
    jax.block_until_ready(loss)
    ref = _reference(x, t)
    assert jnp.isfinite(loss)
    assert jnp.allclose(loss, ref, rtol=1e-4, atol=1e-5), (loss, ref)

    # Case 2: 20 planes -> 2 grid steps with a ragged last block (exercises the in-kernel
    # row mask and the multi-step VMEM accumulation, no wrapper-side padding).
    x2 = jax.random.uniform(k3, (5, 4, 16, 16), dtype=jnp.float32)
    t2 = jax.random.uniform(k4, (5, 4, 16, 16), dtype=jnp.float32)
    loss2 = loss_mod(x2, t2)
    jax.block_until_ready(loss2)
    ref2 = _reference(x2, t2)
    assert jnp.isfinite(loss2)
    assert jnp.allclose(loss2, ref2, rtol=1e-4, atol=1e-5), (loss2, ref2)

    print("KERNEL_OK")
</pallas_src>

<mosaic_0001>
module attributes {stable_mosaic.version = 11 : i64} {
  func.func @kernel(%arg0: i32, %arg1: memref<8x256xf32, #tpu.memory_space<vmem>>, %arg2: memref<8x256xf32, #tpu.memory_space<vmem>>, %arg3: memref<256x256xf32, #tpu.memory_space<vmem>>, %arg4: memref<1x1xf32, #tpu.memory_space<vmem>>, %arg5: memref<8x256xf32, #tpu.memory_space<vmem>>) attributes {dimension_semantics = [#tpu.dimension_semantics<arbitrary>], iteration_bounds = array<i64: 1>, scalar_prefetch = 0 : i64, scratch_operands = 1 : i64, tpu.core_type = #tpu.core_type<tc>, window_params = [{transform_indices = @transform_0, window_bounds = array<i64: 8, 256>}, {transform_indices = @transform_1, window_bounds = array<i64: 8, 256>}, {pipeline_mode = #tpu.pipeline_mode<synchronous>, transform_indices = @transform_2, window_bounds = array<i64: 256, 256>}, {pipeline_mode = #tpu.pipeline_mode<synchronous>, transform_indices = @transform_3, window_bounds = array<i64: 1, 1>}]} {
    %c0_i32 = arith.constant 0 : i32
    %0 = arith.cmpi eq, %arg0, %c0_i32 : i32
    %1 = arith.extui %0 : i1 to i32
    %c0_i32_0 = arith.constant 0 : i32
    %2 = arith.cmpi ne, %1, %c0_i32_0 : i32
    scf.if %2 {
      %cst_12 = arith.constant 0.000000e+00 : f32
      %15 = vector.broadcast %cst_12 : f32 to vector<8x256xf32>
      %c0_13 = arith.constant 0 : index
      %c0_14 = arith.constant 0 : index
      %16 = vector.load %arg5[%c0_13, %c0_14] : memref<8x256xf32, #tpu.memory_space<vmem>>, vector<8x256xf32>
      tpu.vector_store %arg5[%c0_13, %c0_14], %15 {strides = array<i32>} : memref<8x256xf32, #tpu.memory_space<vmem>>, vector<8x256xf32>,
    } else {
    }
    %c0 = arith.constant 0 : index
    %c0_1 = arith.constant 0 : index
    %3 = vector.load %arg1[%c0, %c0_1] : memref<8x256xf32, #tpu.memory_space<vmem>>, vector<8x256xf32>
    %c0_2 = arith.constant 0 : index
    %c0_3 = arith.constant 0 : index
    %4 = vector.load %arg2[%c0_2, %c0_3] : memref<8x256xf32, #tpu.memory_space<vmem>>, vector<8x256xf32>
    %5 = arith.subf %3, %4 : vector<8x256xf32>
    %c0_4 = arith.constant 0 : index
    %c0_5 = arith.constant 0 : index
    %6 = vector.load %arg3[%c0_4, %c0_5] : memref<256x256xf32, #tpu.memory_space<vmem>>, vector<256x256xf32>
    %cst = arith.constant dense<0.000000e+00> : vector<8x256xf32>
    %7 = tpu.matmul %5, %6, %cst {dimension_numbers = #tpu.dot_dimension_numbers<[1], [0], [0], [1], [0, 0, 1, 1], [], []>} : vector<8x256xf32>, vector<256x256xf32>, vector<8x256xf32> -> vector<8x256xf32>
    %c0_6 = arith.constant 0 : index
    %c0_7 = arith.constant 0 : index
    %8 = vector.load %arg5[%c0_6, %c0_7] : memref<8x256xf32, #tpu.memory_space<vmem>>, vector<8x256xf32>
    %9 = math.absf %7 : vector<8x256xf32>
    %10 = arith.addf %8, %9 : vector<8x256xf32>
    %c0_8 = arith.constant 0 : index
    %c0_9 = arith.constant 0 : index
    %11 = vector.load %arg5[%c0_8, %c0_9] : memref<8x256xf32, #tpu.memory_space<vmem>>, vector<8x256xf32>
    tpu.vector_store %arg5[%c0_8, %c0_9], %10 {strides = array<i32>} : memref<8x256xf32, #tpu.memory_space<vmem>>, vector<8x256xf32>,
    %c0_i32_10 = arith.constant 0 : i32
    %12 = arith.cmpi eq, %arg0, %c0_i32_10 : i32
    %13 = arith.extui %12 : i1 to i32
    %c0_i32_11 = arith.constant 0 : i32
    %14 = arith.cmpi ne, %13, %c0_i32_11 : i32
    scf.if %14 {
      %c0_12 = arith.constant 0 : index
      %c0_13 = arith.constant 0 : index
      %15 = vector.load %arg5[%c0_12, %c0_13] : memref<8x256xf32, #tpu.memory_space<vmem>>, vector<8x256xf32>
      %16 = vector.shape_cast %15 : vector<8x256xf32> to vector<1x8x256xf32>
      %cst_14 = arith.constant dense<0.000000e+00> : vector<1xf32>
      %17 = vector.multi_reduction <add>, %16, %cst_14 [1, 2] : vector<1x8x256xf32> to vector<1xf32>
      %18 = vector.shape_cast %17 : vector<1xf32> to vector<1x1x1xf32>
      %19 = vector.extract %18[0, 0, 0] : f32 from vector<1x1x1xf32>
      %20 = vector.broadcast %19 : f32 to vector<1x1xf32>
      %c0_15 = arith.constant 0 : index
      %c0_16 = arith.constant 0 : index
      %21 = vector.load %arg4[%c0_15, %c0_16] : memref<1x1xf32, #tpu.memory_space<vmem>>, vector<1x1xf32>
      tpu.vector_store %arg4[%c0_15, %c0_16], %20 {strides = array<i32>} : memref<1x1xf32, #tpu.memory_space<vmem>>, vector<1x1xf32>,
    } else {
    }
    return
  }
  func.func @transform_0(%arg0: i32) -> (i32, i32) {
    %c0_i32 = arith.constant 0 : i32
    %c0_i32_0 = arith.constant 0 : i32
    return %arg0, %c0_i32 : i32, i32
  }
  func.func @transform_1(%arg0: i32) -> (i32, i32) {
    %c0_i32 = arith.constant 0 : i32
    %c0_i32_0 = arith.constant 0 : i32
    return %arg0, %c0_i32 : i32, i32
  }
  func.func @transform_2(%arg0: i32) -> (i32, i32) {
    %c0_i32 = arith.constant 0 : i32
    %c0_i32_0 = arith.constant 0 : i32
    %c0_i32_1 = arith.constant 0 : i32
    return %c0_i32, %c0_i32_0 : i32, i32
  }
  func.func @transform_3(%arg0: i32) -> (i32, i32) {
    %c0_i32 = arith.constant 0 : i32
    %c0_i32_0 = arith.constant 0 : i32
    %c0_i32_1 = arith.constant 0 : i32
    return %c0_i32, %c0_i32_0 : i32, i32
  }
}

</mosaic_0001>

<bundles_post_ra>
// kernel: tpu_custom_call.1
= control target key start
LH: loop header
LB: loop body
LE: loop exit
PB: predicated region body
PF: predicated region fallthrough
CT: control target
= control target key end

     0   :  { %8 = vsyncpa [#allocation4], 0  ;;  %s406_s0 = inlined_call_operand.hbm [shape: f32[8,256], index: 0, kind: input, shape index: {}]   ;;  %s407_s1 = inlined_call_operand.hbm [shape: f32[8,256], index: 1, kind: input, shape index: {}]   ;;  %s408_s2 = inlined_call_operand.hbm [shape: f32[256,256], index: 2, kind: input, shape index: {}]   ;;  %s409_s3 = inlined_call_operand.hbm [shape: f32[1,1], index: 3, kind: output, shape index: {}]  }
   0x1   :  { %9 = vsyncpa [#allocation7], 0  ;;  %s27_s14 = sshll.u32 %s407_s1, 4  ;;  %s28_s14 = int_to_ptr.hbm [resolvable:$true] %s27_s14 }
   0x2   :  { %10 = vsyncpa [#allocation5], 0  ;;  %s368_s15 = smov [#allocation6]   ;;  %s16_s19 = sshll.u32 %s406_s0, 4  ;;  %s17_s19 = int_to_ptr.hbm [resolvable:$true] %s16_s19 }
   0x3   :  { %s29_s16 = sshll.u32 %s368_s15, 4  ;;  %s369_s20 = smov [#allocation3]   ;;  %s30_s16 = int_to_ptr.vmem [resolvable:$true] %s29_s16 }
   0x4   :  { %32 = dma.hbm_to_vmem [thread:$0]  %s28_s14, 256, %s30_s16, [#allocation7]  }
   0x5   :  { %s18_s21 = sshll.u32 %s369_s20, 4  ;;  %s37_s24 = sshll.u32 %s408_s2, 4  ;;  %s19_s21 = int_to_ptr.vmem [resolvable:$true] %s18_s21  ;;  %s38_s24 = int_to_ptr.hbm [resolvable:$true] %s37_s24 }
   0x6   :  { %21 = dma.hbm_to_vmem [thread:$0]  %s17_s19, 256, %s19_s21, [#allocation4]  }
   0x7   :  { %s370_s1 = smov [#allocation8]   ;;  %s371_s26 = smov 256  }
   0x8   :  { %s39_s25 = sshll.u32 %s370_s1, 4  ;;  %s372_s27 = smov 16   ;;  %s40_s25 = int_to_ptr.vmem [resolvable:$true] %s39_s25 }
   0x9   :  { %45 = dma.hbm_to_vmem [thread:$0]  %s38_s24, 8192, %s40_s25, [#allocation7], %s371_s26, %s371_s26, %s372_s27  }
   0xa   :  { %362 = dma.done.wait [#allocation4], 256  }
   0xb   :  { %363 = vsyncadd [#allocation4], 4294967040 }
   0xc   :  { %364 = dma.done.wait [#allocation7], 8448  }
   0xd   :  { %365 = vsyncadd [#allocation7], 4294958848  ;;  %v101_v0 = vld [vmem:[#allocation8 + $0xf8] sm:$0xff]  ;;  %v99_v2 = vld [vmem:[#allocation8 + $0xe8] sm:$0xff]  ;;  %s373_s0 = smov [#allocation9]   ;;  %s247_s30 = sshll.u32 %s409_s3, 4  ;;  %s248_s30 = int_to_ptr.hbm [resolvable:$true] %s247_s30 }
   0xe   :  { %v133_v1 = vld [vmem:[#allocation8 + $0x1f8] sm:$0xff]  ;;  %174 = vmatpush.msra.mxu2 %v101_v0  ;;  %v131_v3 = vld [vmem:[#allocation8 + $0x1e8] sm:$0xff]  ;;  %v100_v6 = vld [vmem:[#allocation8 + $0xf0] sm:$0xff]  ;;  %s245_s2 = sshll.u32 %s373_s0, 4  ;;  %vm238_vm0 = vcmask 0   ;;  %s246_s2 = int_to_ptr.vmem [resolvable:$true] %s245_s2 }
   0xf   :  { %194 = vmatpush.msra.mxu3 %v133_v1  ;;  %v97_v4 = vld [vmem:[#allocation8 + $0xd8] sm:$0xff]  ;;  %v132_v7 = vld [vmem:[#allocation8 + $0x1f0] sm:$0xff]  ;;  %v98_v8 = vld [vmem:[#allocation8 + $0xe0] sm:$0xff]  ;;  %134 = vmatpush.msra.mxu0 %v100_v6 }
  0x10   :  { %v129_v5 = vld [vmem:[#allocation8 + $0x1d8] sm:$0xff]  ;;  %175 = vmatpush.msra.mxu2 %v99_v2  ;;  %v130_v9 = vld [vmem:[#allocation8 + $0x1e0] sm:$0xff]  ;;  %154 = vmatpush.msra.mxu1 %v132_v7  ;;  %v95_v10 = vld [vmem:[#allocation8 + $0xc8] sm:$0xff] }
  0x11   :  { %195 = vmatpush.msra.mxu3 %v131_v3  ;;  %v127_v11 = vld [vmem:[#allocation8 + $0x1c8] sm:$0xff]  ;;  %v96_v12 = vld [vmem:[#allocation8 + $0xd0] sm:$0xff]  ;;  %135 = vmatpush.msra.mxu0 %v98_v8  ;;  %v93_v14 = vld [vmem:[#allocation8 + $0xb8] sm:$0xff] }
  0x12   :  { %176 = vmatpush.msra.mxu2 %v97_v4  ;;  %v128_v13 = vld [vmem:[#allocation8 + $0x1d0] sm:$0xff]  ;;  %155 = vmatpush.msra.mxu1 %v130_v9  ;;  %v125_v15 = vld [vmem:[#allocation8 + $0x1b8] sm:$0xff]  ;;  %v94_v16 = vld [vmem:[#allocation8 + $0xc0] sm:$0xff] }
  0x13   :  { %196 = vmatpush.msra.mxu3 %v129_v5  ;;  %v126_v17 = vld [vmem:[#allocation8 + $0x1c0] sm:$0xff]  ;;  %136 = vmatpush.msra.mxu0 %v96_v12  ;;  %v91_v18 = vld [vmem:[#allocation8 + $0xa8] sm:$0xff]  ;;  %v92_v20 = vld [vmem:[#allocation8 + $0xb0] sm:$0xff] }
  0x14   :  { %177 = vmatpush.msra.mxu2 %v95_v10  ;;  %156 = vmatpush.msra.mxu1 %v128_v13  ;;  %v123_v19 = vld [vmem:[#allocation8 + $0x1a8] sm:$0xff]  ;;  %v124_v21 = vld [vmem:[#allocation8 + $0x1b0] sm:$0xff]  ;;  %v89_v22 = vld [vmem:[#allocation8 + $0x98] sm:$0xff] }
  0x15   :  { %197 = vmatpush.msra.mxu3 %v127_v11  ;;  %137 = vmatpush.msra.mxu0 %v94_v16  ;;  %v121_v23 = vld [vmem:[#allocation8 + $0x198] sm:$0xff]  ;;  %v90_v24 = vld [vmem:[#allocation8 + $0xa0] sm:$0xff]  ;;  %v87_v26 = vld [vmem:[#allocation8 + $0x88] sm:$0xff] }
  0x16   :  { %178 = vmatpush.msra.mxu2 %v93_v14  ;;  %157 = vmatpush.msra.mxu1 %v126_v17  ;;  %v122_v25 = vld [vmem:[#allocation8 + $0x1a0] sm:$0xff]  ;;  %v119_v27 = vld [vmem:[#allocation8 + $0x188] sm:$0xff]  ;;  %v88_v28 = vld [vmem:[#allocation8 + $0x90] sm:$0xff] }
  0x17   :  { %198 = vmatpush.msra.mxu3 %v125_v15  ;;  %138 = vmatpush.msra.mxu0 %v92_v20  ;;  %v120_v29 = vld [vmem:[#allocation8 + $0x190] sm:$0xff]  ;;  %v85_v30 = vld [vmem:[#allocation8 + $0x78] sm:$0xff]  ;;  %v86_v32 = vld [vmem:[#allocation8 + $0x80] sm:$0xff] }
  0x18   :  { %179 = vmatpush.msra.mxu2 %v91_v18  ;;  %158 = vmatpush.msra.mxu1 %v124_v21  ;;  %v117_v31 = vld [vmem:[#allocation8 + $0x178] sm:$0xff]  ;;  %v118_v33 = vld [vmem:[#allocation8 + $0x180] sm:$0xff]  ;;  %v83_v34 = vld [vmem:[#allocation8 + $0x68] sm:$0xff] }
  0x19   :  { %199 = vmatpush.msra.mxu3 %v123_v19  ;;  %139 = vmatpush.msra.mxu0 %v90_v24  ;;  %v115_v35 = vld [vmem:[#allocation8 + $0x168] sm:$0xff]  ;;  %v84_v36 = vld [vmem:[#allocation8 + $0x70] sm:$0xff]  ;;  %v81_v38 = vld [vmem:[#allocation8 + $0x58] sm:$0xff] }
  0x1a   :  { %180 = vmatpush.msra.mxu2 %v89_v22  ;;  %159 = vmatpush.msra.mxu1 %v122_v25  ;;  %v116_v37 = vld [vmem:[#allocation8 + $0x170] sm:$0xff]  ;;  %v113_v39 = vld [vmem:[#allocation8 + $0x158] sm:$0xff]  ;;  %v82_v40 = vld [vmem:[#allocation8 + $0x60] sm:$0xff] }
  0x1b   :  { %200 = vmatpush.msra.mxu3 %v121_v23  ;;  %140 = vmatpush.msra.mxu0 %v88_v28  ;;  %v114_v41 = vld [vmem:[#allocation8 + $0x160] sm:$0xff]  ;;  %v79_v42 = vld [vmem:[#allocation8 + $0x48] sm:$0xff]  ;;  %v80_v44 = vld [vmem:[#allocation8 + $0x50] sm:$0xff] }
  0x1c   :  { %181 = vmatpush.msra.mxu2 %v87_v26  ;;  %160 = vmatpush.msra.mxu1 %v120_v29  ;;  %v111_v43 = vld [vmem:[#allocation8 + $0x148] sm:$0xff]  ;;  %v112_v45 = vld [vmem:[#allocation8 + $0x150] sm:$0xff]  ;;  %v77_v46 = vld [vmem:[#allocation8 + $0x38] sm:$0xff] }
  0x1d   :  { %201 = vmatpush.msra.mxu3 %v119_v27  ;;  %141 = vmatpush.msra.mxu0 %v86_v32  ;;  %v109_v47 = vld [vmem:[#allocation8 + $0x138] sm:$0xff]  ;;  %v75_v48 = vld [vmem:[#allocation8 + $0x28] sm:$0xff]  ;;  %v78_v50 = vld [vmem:[#allocation8 + $0x40] sm:$0xff] }
  0x1e   :  { %182 = vmatpush.msra.mxu2 %v85_v30  ;;  %161 = vmatpush.msra.mxu1 %v118_v33  ;;  %v107_v49 = vld [vmem:[#allocation8 + $0x128] sm:$0xff]  ;;  %v110_v51 = vld [vmem:[#allocation8 + $0x140] sm:$0xff]  ;;  %v76_v52 = vld [vmem:[#allocation8 + $0x30] sm:$0xff] }
  0x1f   :  { %202 = vmatpush.msra.mxu3 %v117_v31  ;;  %142 = vmatpush.msra.mxu0 %v84_v36  ;;  %v108_v53 = vld [vmem:[#allocation8 + $0x130] sm:$0xff]  ;;  %v64_v54 = vld [vmem:[#allocation3] sm:$0xff]  ;;  %v65_v56 = vld [vmem:[#allocation3 + $0x8] sm:$0xff] }
  0x20   :  { %183 = vmatpush.msra.mxu2 %v83_v34  ;;  %162 = vmatpush.msra.mxu1 %v116_v37  ;;  %v66_v55 = vld [vmem:[#allocation6] sm:$0xff]  ;;  %v67_v57 = vld [vmem:[#allocation6 + $0x8] sm:$0xff]  ;;  %v74_v60 = vld [vmem:[#allocation8 + $0x20] sm:$0xff] }
  0x21   :  { %203 = vmatpush.msra.mxu3 %v115_v35  ;;  %143 = vmatpush.msra.mxu0 %v82_v40  ;;  %v73_v58 = vld [vmem:[#allocation8 + $0x18] sm:$0xff]  ;;  %v106_v61 = vld [vmem:[#allocation8 + $0x120] sm:$0xff]  ;;  %v71_v62 = vld [vmem:[#allocation8 + $0x8] sm:$0xff]  ;;  %v68_v0 = vsub.f32 %v64_v54, %v66_v55  ;;  %v69_v1 = vsub.f32 %v65_v56, %v67_v57 }
  0x22   :  { %184 = vmatpush.msra.mxu2 %v81_v38  ;;  %163 = vmatpush.msra.mxu1 %v114_v41  ;;  %v105_v59 = vld [vmem:[#allocation8 + $0x118] sm:$0xff]  ;;  %v103_v63 = vld [vmem:[#allocation8 + $0x108] sm:$0xff]  ;;  %v72_v2 = vld [vmem:[#allocation8 + $0x10] sm:$0xff] }
  0x23   :  { %204 = vmatpush.msra.mxu3 %v113_v39  ;;  %144 = vmatpush.msra.mxu0 %v80_v44  ;;  %v104_v3 = vld [vmem:[#allocation8 + $0x110] sm:$0xff]  ;;  %v70_v4 = vld [vmem:[#allocation8] sm:$0xff] }
  0x24   :  { %185 = vmatpush.msra.mxu2 %v79_v42  ;;  %164 = vmatpush.msra.mxu1 %v112_v45  ;;  %v102_v5 = vld [vmem:[#allocation8 + $0x100] sm:$0xff] }
  0x25   :  { %205 = vmatpush.msra.mxu3 %v111_v43  ;;  %145 = vmatpush.msra.mxu0 %v78_v50 }
  0x26   :  { %186 = vmatpush.msra.mxu2 %v77_v46  ;;  %165 = vmatpush.msra.mxu1 %v110_v51 }
  0x27   :  { %206 = vmatpush.msra.mxu3 %v109_v47  ;;  %146 = vmatpush.msra.mxu0 %v76_v52 }
  0x28   :  { %187 = vmatpush.msra.mxu2 %v75_v48  ;;  %166 = vmatpush.msra.mxu1 %v108_v53 }
  0x29   :  { %207 = vmatpush.msra.mxu3 %v107_v49  ;;  %147 = vmatpush.msra.mxu0 %v74_v60 }
  0x2a   :  { %188 = vmatpush.msra.mxu2 %v73_v58  ;;  %167 = vmatpush.msra.mxu1 %v106_v61 }
  0x2b   :  { %208 = vmatpush.msra.mxu3 %v105_v59  ;;  %148 = vmatpush.msra.mxu0 %v72_v2 }
  0x2c   :  { %189 = vmatpush.msra.mxu2 %v71_v62  ;;  %168 = vmatpush.msra.mxu1 %v104_v3 }
  0x2d   :  { %209 = vmatpush.msra.mxu3 %v103_v63  ;;  %190 = vmatmul.f32.vlgmr.msra.gmra.mxu2 %v68_v0 }
  0x2e   :  { %210 = vmatmul.f32.vlgmr.msra.gmra.mxu3 %v69_v1  ;;  %149 = vmatpush.msra.mxu0 %v70_v4 }
  0x2f   :  { %169 = vmatpush.msra.mxu1 %v102_v5  ;;  %150 = vmatmul.f32.vlgmr.msra.gmra.mxu0 %v68_v0 }
  0x30   :  { %170 = vmatmul.f32.vlgmr.msra.gmra.mxu1 %v69_v1 }
  0xac   :  { %v151_v6 = vpop.f32.mrf.mxu0 }
  0xad   :  { %v171_v7 = vpop.f32.mrf.mxu1 }
  0xae   :  { %v172_v8 = vadd.f32 %v171_v7, %v151_v6 }
  0xb0   :  { %v191_v9 = vpop.f32.mrf.mxu2  ;;  %v216_v11 = vand.u32 2147483647, %v172_v8 }
  0xb1   :  { %v211_v10 = vpop.f32.mrf.mxu3 }
  0xb2   :  { %v212_v12 = vadd.f32 %v211_v10, %v191_v9 }
  0xb4   :  { %v217_v13 = vand.u32 2147483647, %v212_v12 }
  0xb6   :  { %v227_v14 = vadd.f32 %v217_v13, %v216_v11 }
  0xb8   :  { %228 = vadd.xlane.f32.xlu0 %v227_v14 }
 0x12b   :  { %v229_v15 = vpop.xlane.xlu0 %228 }
 0x12c   :  { %v230_v16 = vrot.slane %v229_v15, 4 }
 0x12e   :  { %v231_v17 = vadd.f32 %v230_v16, %v229_v15 }
 0x130   :  { %v232_v18 = vrot.slane %v231_v17, 2 }
 0x132   :  { %v233_v19 = vadd.f32 %v232_v18, %v231_v17 }
 0x134   :  { %v234_v20 = vrot.slane %v233_v19, 1 }
 0x136   :  { %v235_v21 = vadd.f32 %v234_v20, %v233_v19 }
 0x138   :  { %258 = vpush %v235_v21 }
 0x169   :  { %s259_s4 = spop %258 }
 0x16a   :  { %v237_v22 = vstv %s259_s4 }
 0x16b   :  { %239 = vst.msk [vmem:[#allocation9] sm:$0x1] %vm238_vm0, %v237_v22 }
 0x16c   :  { %250 = dma.vmem_to_hbm [thread:$0]  %s246_s2, 16, %s248_s30, [#allocation5]  }
 0x16d   :  { %366 = dma.done.wait [#allocation5], 16  }
 0x16e   :  { %367 = vsyncadd [#allocation5], 4294967280 }
 0x16f   :  { %255 = vsyncpa [#allocation4], 1 }
 0x170   :  { %256 = vsyncpa [#allocation7], 1 }
 0x171   :  { %257 = vsyncpa [#allocation5], 1 }

</bundles_post_ra>
